<compile_context>
chip_gen: v5e
topology: v5e:2x2
jax: 0.10.0
libtpu: 0.0.40
codegen_flags: <defaults>
</compile_context>

<pallas_src>
import math
from functools import partial

import jax
import jax.numpy as jnp
from jax import lax
from jax.experimental import pallas as pl
from jax.experimental.pallas import tpu as pltpu


def _round_up(x, m):
    return ((x + m - 1) // m) * m


def _choose_tile(N, n_h, halo, max_tile):
    """Largest tile that keeps ~2x2 pipeline buffers + temporaries in budget."""
    budget = 16 * 1024 * 1024          # in-flight VMEM target (well under limits)
    per_row = 7 * n_h * 4              # 2 inputs x 2 buffers + ~3 f32 temporaries
    t = min(max_tile, max(budget // per_row, 128))
    t = max(128, (t // 128) * 128)
    # Keep >= 2 tiles when N allows it so both v7x TensorCores get work.
    t = min(t, _round_up(pl.cdiv(max(N, 1), 2), 128))
    t = max(t, 128)
    if halo > 128:
        t = _round_up(max(t, halo), halo)
    return t


def _disc_kernel(h_ref, w_ref, c_ref, halo_ref, wrap_ref, bias_ref, o_ref):
    # h_ref    : (TILE_N, n_h)  node embeddings for this tile
    # w_ref    : (n_h, n_h)     bilinear weight (out_features=1 squeezed)
    # c_ref    : (TILE_N, n_h)  context rows for the same node range
    # halo_ref : (HALO, n_h)    last HALO rows of the previous tile of c
    # wrap_ref : (HALO, n_h)    wrap rows c[(j-r) mod (N-1)] (tile 0 only)
    # bias_ref : (1,) SMEM      bilinear bias (scalar)
    # o_ref    : (K, TILE_N)    scores, K-major (matches torch.cat ordering)
    K = o_ref.shape[0]
    HALO = halo_ref.shape[0]
    b = bias_ref[0]

    # Single MXU matmul per tile, shared across all K shifted contexts.
    t = jnp.dot(h_ref[...], w_ref[...], preferred_element_type=jnp.float32)
    ct = c_ref[...].astype(jnp.float32)

    # r = 0: context is c itself (row N-1 included; no wrap semantics).
    o_ref[0, :] = jnp.sum(t * ct, axis=-1) + b

    if K > 1:
        # Halo rows: previous tile's last HALO rows of c; tile 0 uses the
        # precomputed wrap rows instead.
        halo = jnp.where(pl.program_id(0) == 0,
                         wrap_ref[...], halo_ref[...]).astype(jnp.float32)
        t_head = t[:HALO, :]            # 8-row aligned slices only
        ct_head = ct[:HALO, :]
        row = lax.broadcasted_iota(jnp.int32, (HALO, ct.shape[1]), 0)

        for r in range(1, K):           # K is tiny; static loop
            # Bulk rows j >= r need c[s + j - r] == roll(ct, r)[j]  (XLU roll,
            # no concat / unaligned slice copies).
            win = pltpu.roll(ct, shift=r, axis=0)
            o_ref[r, :] = jnp.sum(t * win, axis=-1) + b
            # First HALO rows: j < r come from the halo/wrap rows, j >= r from
            # ct.  Overwrite (not correct-by-subtraction) so rolled-in stale
            # tail rows of a ragged last tile can never leak NaN/Inf.
            head = jnp.where(row >= r,
                             pltpu.roll(ct_head, shift=r, axis=0),
                             pltpu.roll(halo, shift=r, axis=0))
            o_ref[r, :HALO] = jnp.sum(t_head * head, axis=-1) + b


@partial(jax.jit, static_argnames=("negsamp_round", "max_tile"))
def contextual_discriminator_forward(c, h_pl, weight, bias, *,
                                     negsamp_round, max_tile=4096):
    """JAX/Pallas equivalent of Contextual_Discriminator.forward.

    c, h_pl : (N, n_h)
    weight  : (n_h, n_h)   nn.Bilinear weight with out_features=1 squeezed
    bias    : (1,)
    returns : ((negsamp_round + 1) * N, 1) float32
    """
    N, n_h = c.shape
    K = negsamp_round + 1
    if negsamp_round > 0 and N < 2:
        # torch's c[-2:-1] needs at least 2 rows.
        raise ValueError("negative sampling requires N >= 2")

    HALO = max(8, int(pl.next_power_of_2(max(K - 1, 1))))
    TILE_N = _choose_tile(N, n_h, HALO, max_tile)
    assert TILE_N % HALO == 0 and TILE_N >= HALO

    # Wrap rows consumed only by tile 0: wrap[HALO - m] = c[(-m) mod (N-1)].
    wrap = jnp.zeros((HALO, n_h), dtype=c.dtype)
    if K > 1:
        m = jnp.arange(K - 1, 0, -1)                 # r - j = K-1 ... 1
        rows = (-m) % (N - 1)
        wrap = wrap.at[HALO - (K - 1):].set(c[rows])

    # Large N streams un-copied; only tiny inputs (N < 128) get a <128-row pad.
    if N < TILE_N:
        pad = TILE_N - N
        h_in = jnp.pad(h_pl, ((0, pad), (0, 0)))
        c_in = jnp.pad(c, ((0, pad), (0, 0)))
        n_rows = TILE_N
    else:
        h_in, c_in, n_rows = h_pl, c, N

    num_tiles = pl.cdiv(n_rows, TILE_N)
    hpt = TILE_N // HALO

    out = pl.pallas_call(
        _disc_kernel,
        out_shape=jax.ShapeDtypeStruct((K, n_rows), jnp.float32),
        grid=(num_tiles,),
        in_specs=[
            pl.BlockSpec((TILE_N, n_h), lambda i: (i, 0)),              # h tile
            pl.BlockSpec((n_h, n_h), lambda i: (0, 0)),                 # weight
            pl.BlockSpec((TILE_N, n_h), lambda i: (i, 0)),              # c tile
            pl.BlockSpec((HALO, n_h),
                         lambda i: (jnp.maximum(i * hpt - 1, 0), 0)),   # prev halo
            pl.BlockSpec((HALO, n_h), lambda i: (0, 0)),                # wrap rows
            pl.BlockSpec(memory_space=pltpu.SMEM),                      # bias
        ],
        out_specs=pl.BlockSpec((K, TILE_N), lambda i: (0, i)),
        compiler_params=pltpu.CompilerParams(
            dimension_semantics=("parallel",),
            vmem_limit_bytes=32 * 1024 * 1024),
    )(h_in, weight, c_in, c_in, wrap, bias)

    # torch.cat of K blocks of shape (N, 1) along dim 0  ==  K-major flatten.
    return out[:, :N].reshape(K * N, 1)


def _reference_forward(c, h_pl, weight, bias, negsamp_round):
    """Pure-JAX reference of the PyTorch semantics for verification."""
    def f_k(x1, x2):
        return jnp.einsum('ni,ij,nj->n', x1, weight, x2)[:, None] + bias[0]
    scs = [f_k(h_pl, c)]
    c_mi = c
    for _ in range(negsamp_round):
        c_mi = jnp.concatenate([c_mi[-2:-1, :], c_mi[:-1, :]], axis=0)
        scs.append(f_k(h_pl, c_mi))
    return jnp.concatenate(scs, axis=0)


def _run_case(N, n_h, negsamp_round, max_tile, key):
    k_w, k_c, k_h = jax.random.split(key, 3)
    # xavier_uniform_ on the (1, n_h, n_h) Bilinear weight; bias filled with 0.
    fan_in, fan_out = n_h * n_h, 1 * n_h
    bound = math.sqrt(6.0 / (fan_in + fan_out))
    weight = jax.random.uniform(k_w, (n_h, n_h), jnp.float32, -bound, bound)
    bias = jnp.zeros((1,), dtype=jnp.float32)
    c = jax.random.normal(k_c, (N, n_h), dtype=jnp.float32)
    h_pl = jax.random.normal(k_h, (N, n_h), dtype=jnp.float32)

    out = contextual_discriminator_forward(
        c, h_pl, weight, bias, negsamp_round=negsamp_round, max_tile=max_tile)
    out = jax.block_until_ready(out)

    ref = _reference_forward(c, h_pl, weight, bias, negsamp_round)
    assert out.shape == ((negsamp_round + 1) * N, 1), out.shape
    err = float(jnp.max(jnp.abs(out - ref)))
    assert jnp.allclose(out, ref, atol=1e-4, rtol=1e-4), err


if __name__ == "__main__":
    key = jax.random.PRNGKey(0)
    k1, k2, k3 = jax.random.split(key, 3)

    # Small, module-consistent shapes (single tile, wrap rows + tiny-N pad path).
    _run_case(N=8, n_h=32, negsamp_round=2, max_tile=4096, key=k1)
    # Multi-tile, ragged-tail case: grid, backward halo DMA and clipped writes.
    _run_case(N=300, n_h=64, negsamp_round=2, max_tile=4096, key=k2)
    # negsamp_round == 0 path (K == 1, no shifts).
    _run_case(N=300, n_h=64, negsamp_round=0, max_tile=4096, key=k3)

    print("KERNEL_OK")
</pallas_src>

<mosaic_0001>
module attributes {stable_mosaic.version = 11 : i64} {
  func.func @_disc_kernel(%arg0: i32, %arg1: memref<128x32xf32, #tpu.memory_space<vmem>>, %arg2: memref<32x32xf32, #tpu.memory_space<vmem>>, %arg3: memref<128x32xf32, #tpu.memory_space<vmem>>, %arg4: memref<8x32xf32, #tpu.memory_space<vmem>>, %arg5: memref<8x32xf32, #tpu.memory_space<vmem>>, %arg6: memref<1xf32, #tpu.memory_space<smem>>, %arg7: memref<3x128xf32, #tpu.memory_space<vmem>>) attributes {dimension_semantics = [#tpu.dimension_semantics<parallel>], iteration_bounds = array<i64: 1>, scalar_prefetch = 0 : i64, scratch_operands = 0 : i64, tpu.core_type = #tpu.core_type<tc>, window_params = [{transform_indices = @transform_0, window_bounds = array<i64: 128, 32>}, {pipeline_mode = #tpu.pipeline_mode<synchronous>, transform_indices = @transform_1, window_bounds = array<i64: 32, 32>}, {transform_indices = @transform_2, window_bounds = array<i64: 128, 32>}, {transform_indices = @transform_3, window_bounds = array<i64: 8, 32>}, {pipeline_mode = #tpu.pipeline_mode<synchronous>, transform_indices = @transform_4, window_bounds = array<i64: 8, 32>}, {transform_indices = @transform_5, window_bounds = array<i64: 1>}, {transform_indices = @transform_6, window_bounds = array<i64: 3, 128>}]} {
    %c0 = arith.constant 0 : index
    %0 = memref.load %arg6[%c0] : memref<1xf32, #tpu.memory_space<smem>>
    %c0_0 = arith.constant 0 : index
    %c0_1 = arith.constant 0 : index
    %1 = vector.load %arg1[%c0_0, %c0_1] : memref<128x32xf32, #tpu.memory_space<vmem>>, vector<128x32xf32>
    %c0_2 = arith.constant 0 : index
    %c0_3 = arith.constant 0 : index
    %2 = vector.load %arg2[%c0_2, %c0_3] : memref<32x32xf32, #tpu.memory_space<vmem>>, vector<32x32xf32>
    %cst = arith.constant dense<0.000000e+00> : vector<128x32xf32>
    %3 = tpu.matmul %1, %2, %cst {dimension_numbers = #tpu.dot_dimension_numbers<[1], [0], [0], [1], [0, 0, 1, 1], [], []>} : vector<128x32xf32>, vector<32x32xf32>, vector<128x32xf32> -> vector<128x32xf32>
    %c0_4 = arith.constant 0 : index
    %c0_5 = arith.constant 0 : index
    %4 = vector.load %arg3[%c0_4, %c0_5] : memref<128x32xf32, #tpu.memory_space<vmem>>, vector<128x32xf32>
    %5 = arith.mulf %3, %4 : vector<128x32xf32>
    %cst_6 = arith.constant dense<0.000000e+00> : vector<128xf32>
    %6 = vector.multi_reduction <add>, %5, %cst_6 [1] : vector<128x32xf32> to vector<128xf32>
    %7 = vector.broadcast %0 : f32 to vector<128xf32>
    %8 = arith.addf %6, %7 : vector<128xf32>
    %c0_7 = arith.constant 0 : index
    %c0_8 = arith.constant 0 : index
    %9 = vector.load %arg7[%c0_7, %c0_8] : memref<3x128xf32, #tpu.memory_space<vmem>>, vector<1x128xf32>
    %10 = vector.shape_cast %9 : vector<1x128xf32> to vector<128xf32>
    %11 = vector.shape_cast %8 : vector<128xf32> to vector<1x128xf32>
    tpu.vector_store %arg7[%c0_7, %c0_8], %11 {strides = array<i32>} : memref<3x128xf32, #tpu.memory_space<vmem>>, vector<1x128xf32>,
    %c0_i32 = arith.constant 0 : i32
    %12 = arith.cmpi eq, %arg0, %c0_i32 : i32
    %c0_9 = arith.constant 0 : index
    %c0_10 = arith.constant 0 : index
    %13 = vector.load %arg5[%c0_9, %c0_10] : memref<8x32xf32, #tpu.memory_space<vmem>>, vector<8x32xf32>
    %c0_11 = arith.constant 0 : index
    %c0_12 = arith.constant 0 : index
    %14 = vector.load %arg4[%c0_11, %c0_12] : memref<8x32xf32, #tpu.memory_space<vmem>>, vector<8x32xf32>
    %15 = arith.select %12, %13, %14 : vector<8x32xf32>
    %16 = vector.extract_strided_slice %3 {offsets = [0, 0], sizes = [8, 32], strides = [1, 1]} : vector<128x32xf32> to vector<8x32xf32>
    %17 = vector.extract_strided_slice %4 {offsets = [0, 0], sizes = [8, 32], strides = [1, 1]} : vector<128x32xf32> to vector<8x32xf32>
    %18 = tpu.iota {dimensions = array<i32: 0>} : vector<8x32xi32>
    %c1_i32 = arith.constant 1 : i32
    %19 = tpu.dynamic_rotate %4 by %c1_i32 dim 0 : vector<128x32xf32>, i32 -> vector<128x32xf32>
    %20 = arith.mulf %3, %19 : vector<128x32xf32>
    %cst_13 = arith.constant dense<0.000000e+00> : vector<128xf32>
    %21 = vector.multi_reduction <add>, %20, %cst_13 [1] : vector<128x32xf32> to vector<128xf32>
    %22 = vector.broadcast %0 : f32 to vector<128xf32>
    %23 = arith.addf %21, %22 : vector<128xf32>
    %c1 = arith.constant 1 : index
    %c0_14 = arith.constant 0 : index
    %24 = vector.load %arg7[%c1, %c0_14] : memref<3x128xf32, #tpu.memory_space<vmem>>, vector<1x128xf32>
    %25 = vector.shape_cast %24 : vector<1x128xf32> to vector<128xf32>
    %26 = vector.shape_cast %23 : vector<128xf32> to vector<1x128xf32>
    tpu.vector_store %arg7[%c1, %c0_14], %26 {strides = array<i32>} : memref<3x128xf32, #tpu.memory_space<vmem>>, vector<1x128xf32>,
    %c1_i32_15 = arith.constant 1 : i32
    %27 = vector.broadcast %c1_i32_15 : i32 to vector<8x32xi32>
    %28 = arith.cmpi sge, %18, %27 : vector<8x32xi32>
    %c1_i32_16 = arith.constant 1 : i32
    %29 = tpu.dynamic_rotate %17 by %c1_i32_16 dim 0 : vector<8x32xf32>, i32 -> vector<8x32xf32>
    %c1_i32_17 = arith.constant 1 : i32
    %30 = tpu.dynamic_rotate %15 by %c1_i32_17 dim 0 : vector<8x32xf32>, i32 -> vector<8x32xf32>
    %31 = arith.select %28, %29, %30 : vector<8x32xi1>, vector<8x32xf32>
    %32 = arith.mulf %16, %31 : vector<8x32xf32>
    %cst_18 = arith.constant dense<0.000000e+00> : vector<8xf32>
    %33 = vector.multi_reduction <add>, %32, %cst_18 [1] : vector<8x32xf32> to vector<8xf32>
    %34 = vector.broadcast %0 : f32 to vector<8xf32>
    %35 = arith.addf %33, %34 : vector<8xf32>
    %c1_19 = arith.constant 1 : index
    %c0_20 = arith.constant 0 : index
    %36 = vector.load %arg7[%c1_19, %c0_20] : memref<3x128xf32, #tpu.memory_space<vmem>>, vector<1x8xf32>
    %37 = vector.shape_cast %36 : vector<1x8xf32> to vector<8xf32>
    %38 = vector.shape_cast %35 : vector<8xf32> to vector<1x8xf32>
    tpu.vector_store %arg7[%c1_19, %c0_20], %38 {strides = array<i32>} : memref<3x128xf32, #tpu.memory_space<vmem>>, vector<1x8xf32>,
    %c2_i32 = arith.constant 2 : i32
    %39 = tpu.dynamic_rotate %4 by %c2_i32 dim 0 : vector<128x32xf32>, i32 -> vector<128x32xf32>
    %40 = arith.mulf %3, %39 : vector<128x32xf32>
    %cst_21 = arith.constant dense<0.000000e+00> : vector<128xf32>
    %41 = vector.multi_reduction <add>, %40, %cst_21 [1] : vector<128x32xf32> to vector<128xf32>
    %42 = vector.broadcast %0 : f32 to vector<128xf32>
    %43 = arith.addf %41, %42 : vector<128xf32>
    %c2 = arith.constant 2 : index
    %c0_22 = arith.constant 0 : index
    %44 = vector.load %arg7[%c2, %c0_22] : memref<3x128xf32, #tpu.memory_space<vmem>>, vector<1x128xf32>
    %45 = vector.shape_cast %44 : vector<1x128xf32> to vector<128xf32>
    %46 = vector.shape_cast %43 : vector<128xf32> to vector<1x128xf32>
    tpu.vector_store %arg7[%c2, %c0_22], %46 {strides = array<i32>} : memref<3x128xf32, #tpu.memory_space<vmem>>, vector<1x128xf32>,
    %c2_i32_23 = arith.constant 2 : i32
    %47 = vector.broadcast %c2_i32_23 : i32 to vector<8x32xi32>
    %48 = arith.cmpi sge, %18, %47 : vector<8x32xi32>
    %c2_i32_24 = arith.constant 2 : i32
    %49 = tpu.dynamic_rotate %17 by %c2_i32_24 dim 0 : vector<8x32xf32>, i32 -> vector<8x32xf32>
    %c2_i32_25 = arith.constant 2 : i32
    %50 = tpu.dynamic_rotate %15 by %c2_i32_25 dim 0 : vector<8x32xf32>, i32 -> vector<8x32xf32>
    %51 = arith.select %48, %49, %50 : vector<8x32xi1>, vector<8x32xf32>
    %52 = arith.mulf %16, %51 : vector<8x32xf32>
    %cst_26 = arith.constant dense<0.000000e+00> : vector<8xf32>
    %53 = vector.multi_reduction <add>, %52, %cst_26 [1] : vector<8x32xf32> to vector<8xf32>
    %54 = vector.broadcast %0 : f32 to vector<8xf32>
    %55 = arith.addf %53, %54 : vector<8xf32>
    %c2_27 = arith.constant 2 : index
    %c0_28 = arith.constant 0 : index
    %56 = vector.load %arg7[%c2_27, %c0_28] : memref<3x128xf32, #tpu.memory_space<vmem>>, vector<1x8xf32>
    %57 = vector.shape_cast %56 : vector<1x8xf32> to vector<8xf32>
    %58 = vector.shape_cast %55 : vector<8xf32> to vector<1x8xf32>
    tpu.vector_store %arg7[%c2_27, %c0_28], %58 {strides = array<i32>} : memref<3x128xf32, #tpu.memory_space<vmem>>, vector<1x8xf32>,
    return
  }
  func.func @transform_0(%arg0: i32) -> (i32, i32) {
    %c0_i32 = arith.constant 0 : i32
    %c0_i32_0 = arith.constant 0 : i32
    return %arg0, %c0_i32 : i32, i32
  }
  func.func @transform_1(%arg0: i32) -> (i32, i32) {
    %c0_i32 = arith.constant 0 : i32
    %c0_i32_0 = arith.constant 0 : i32
    %c0_i32_1 = arith.constant 0 : i32
    return %c0_i32, %c0_i32_0 : i32, i32
  }
  func.func @transform_2(%arg0: i32) -> (i32, i32) {
    %c0_i32 = arith.constant 0 : i32
    %c0_i32_0 = arith.constant 0 : i32
    return %arg0, %c0_i32 : i32, i32
  }
  func.func @transform_3(%arg0: i32) -> (i32, i32) {
    %c16_i32 = arith.constant 16 : i32
    %0 = arith.muli %arg0, %c16_i32 : i32
    %c1_i32 = arith.constant 1 : i32
    %1 = arith.subi %0, %c1_i32 : i32
    %c0_i32 = arith.constant 0 : i32
    %2 = arith.maxsi %1, %c0_i32 : i32
    %c0_i32_0 = arith.constant 0 : i32
    %c0_i32_1 = arith.constant 0 : i32
    return %2, %c0_i32_0 : i32, i32
  }
  func.func @transform_4(%arg0: i32) -> (i32, i32) {
    %c0_i32 = arith.constant 0 : i32
    %c0_i32_0 = arith.constant 0 : i32
    %c0_i32_1 = arith.constant 0 : i32
    return %c0_i32, %c0_i32_0 : i32, i32
  }
  func.func @transform_5(%arg0: i32) -> i32 {
    %c0_i32 = arith.constant 0 : i32
    %c0_i32_0 = arith.constant 0 : i32
    return %c0_i32 : i32
  }
  func.func @transform_6(%arg0: i32) -> (i32, i32) {
    %c0_i32 = arith.constant 0 : i32
    %c0_i32_0 = arith.constant 0 : i32
    return %c0_i32, %arg0 : i32, i32
  }
}

</mosaic_0001>

<bundles_post_ra>
// kernel: contextual_discriminator_forward.1
= control target key start
LH: loop header
LB: loop body
LE: loop exit
PB: predicated region body
PF: predicated region fallthrough
CT: control target
= control target key end

     0   :  { %vm77_vm0 = vcmask 261120   ;;  %v304_v20 = vlaneseq  ;;  %vm309_vm5 = vcmask 130112   ;;  %vm313_vm6 = vcmask 195712   ;;  %s1544_s1 = inlined_call_operand.vmem [shape: f32[32,32], index: 1, kind: input, shape index: {}]   ;;  %s1545_s3 = inlined_call_operand.vmem [shape: f32[128,32], index: 3, kind: input, shape index: {}, may-alias: {2,3}]   ;;  %s1546_s0 = inlined_call_operand.vmem [shape: f32[128,32], index: 0, kind: input, shape index: {}]   ;;  %s1547_s2 = inlined_call_operand.vmem [shape: f32[128,32], index: 2, kind: input, shape index: {}, may-alias: {2,3}]   ;;  %s1548_s4 = inlined_call_operand.vmem [shape: f32[8,32], index: 4, kind: input, shape index: {}]   ;;  %s1549_s5 = inlined_call_operand.<no memory space> [shape: f32[1], index: 5, kind: input, shape index: {}]   ;;  %s1550_s6 = inlined_call_operand.vmem [shape: f32[3,128], index: 6, kind: output, shape index: {}]  }
   0x1   :  { %v76_v0 = vld [vmem:[%s1544_s1 + $0x18] sm:$0xff]  ;;  %v75_v1 = vld [vmem:[%s1544_s1 + $0x10] sm:$0xff]  ;;  %v74_v2 = vld [vmem:[%s1544_s1 + $0x8] sm:$0xff]  ;;  %vm317_vm7 = vcmask 261312   ;;  %vm321_vm8 = vcmask 326912   ;;  %vm325_vm9 = vcmask 392512  }
   0x2   :  { %138 = vmatpush.msra.mxu0 %v76_v0  ;;  %753 = vmatpush.msra.mxu1 %v76_v0  ;;  %v73_v3 = vld [vmem:[%s1544_s1] sm:$0xff]  ;;  %v58_v8 = vld [vmem:[%s1546_s0 + $0x8] sm:$0xff]  ;;  %v59_v12 = vld [vmem:[%s1546_s0 + $0x10] sm:$0xff]  ;;  %v880_v22 = vshrl.u32 %v304_v20, 7  ;;  %vm329_vm10 = vcmask 458112   ;;  %vm333_vm11 = vcmask 523712  }
   0x3   :  { %754 = vmatpush.msra.mxu2 %v76_v0  ;;  %755 = vmatpush.msra.mxu3 %v76_v0  ;;  %v57_v4 = vld [vmem:[%s1546_s0] sm:$0xff]  ;;  %v62_v9 = vld [vmem:[%s1546_s0 + $0x28] sm:$0xff]  ;;  %v63_v13 = vld [vmem:[%s1546_s0 + $0x30] sm:$0xff]  ;;  %vm337_vm12 = vcmask 589312   ;;  %vm341_vm13 = vcmask 654912   ;;  %vm345_vm14 = vcmask 720512  }
   0x4   :  { %139 = vmatpush.msra.mxu0 %v75_v1  ;;  %756 = vmatpush.msra.mxu1 %v75_v1  ;;  %v61_v5 = vld [vmem:[%s1546_s0 + $0x20] sm:$0xff]  ;;  %v70_v10 = vld [vmem:[%s1546_s0 + $0x68] sm:$0xff]  ;;  %v67_v14 = vld [vmem:[%s1546_s0 + $0x50] sm:$0xff]  ;;  %vm540_vm1 = vcmp.ge.s32.totalorder %v880_v22, 1  ;;  %vm715_vm2 = vcmp.ge.s32.totalorder %v880_v22, 2  ;;  %vm394_vm3 = vcmp.lt.s32.totalorder %v880_v22, 1 }
   0x5   :  { %757 = vmatpush.msra.mxu2 %v75_v1  ;;  %758 = vmatpush.msra.mxu3 %v75_v1  ;;  %v65_v6 = vld [vmem:[%s1546_s0 + $0x40] sm:$0xff]  ;;  %v66_v11 = vld [vmem:[%s1546_s0 + $0x48] sm:$0xff]  ;;  %v71_v15 = vld [vmem:[%s1546_s0 + $0x70] sm:$0xff]  ;;  %vm569_vm4 = vcmp.lt.s32.totalorder %v880_v22, 2  ;;  %vm349_vm15 = vcmask 786112  }
   0x6   :  { %140 = vmatpush.msra.mxu0 %v74_v2  ;;  %759 = vmatpush.msra.mxu1 %v74_v2  ;;  %v69_v7 = vld [vmem:[%s1546_s0 + $0x60] sm:$0xff]  ;;  %v60_v16 = vld [vmem:[%s1546_s0 + $0x18] sm:$0xff] }
   0x7   :  { %760 = vmatpush.msra.mxu2 %v74_v2  ;;  %761 = vmatpush.msra.mxu3 %v74_v2  ;;  %v64_v17 = vld [vmem:[%s1546_s0 + $0x38] sm:$0xff]  ;;  %v191_v21 = vld [vmem:[%s1547_s2] sm:$0xff]  ;;  %v974_v2 = vld [vmem:[%s1547_s2 + $0x8] sm:$0xff] }
   0x8   :  { %141 = vmatpush.msra.mxu0 %v73_v3  ;;  %762 = vmatpush.msra.mxu1 %v73_v3  ;;  %v68_v18 = vld [vmem:[%s1546_s0 + $0x58] sm:$0xff]  ;;  %v882_v23 = vrot.slane %v191_v21, 7  ;;  %v370_v24 = vld [vmem:[%s1548_s4] sm:$0xff]  ;;  %v887_v25 = vrot.slane %v191_v21, 6 }
   0x9   :  { %737 = vmatmul.msk.f32.vlgmr.msra.gmra.mxu0 %vm77_vm0, %v57_v4  ;;  %741 = vmatmul.msk.f32.vlgmr.msra.gmra.mxu1 %vm77_vm0, %v61_v5  ;;  %v72_v19 = vld [vmem:[%s1546_s0 + $0x78] sm:$0xff]  ;;  %v541_v26 = vrot.slane %v370_v24, 7  ;;  %v716_v28 = vrot.slane %v370_v24, 6  ;;  %v908_v33 = vld [vmem:[%s1547_s2 + $0x20] sm:$0xff] }
   0xa   :  { %763 = vmatpush.msra.mxu2 %v73_v3  ;;  %764 = vmatpush.msra.mxu3 %v73_v3  ;;  %v896_v30 = vld [vmem:[%s1547_s2 + $0x78] sm:$0xff]  ;;  %v382_v35 = vrot.slane %v908_v33, 7  ;;  %v557_v39 = vrot.slane %v908_v33, 6  ;;  %v939_v50 = vld [vmem:[%s1547_s2 + $0x60] sm:$0xff] }
   0xb   :  { %745 = vmatmul.msk.f32.vlgmr.msra.gmra.mxu2 %vm77_vm0, %v65_v6  ;;  %749 = vmatmul.msk.f32.vlgmr.msra.gmra.mxu3 %vm77_vm0, %v69_v7  ;;  %v542_v27 = vsel %vm540_vm1, %v882_v23, %v541_v26  ;;  %v717_v29 = vsel %vm715_vm2, %v887_v25, %v716_v28  ;;  %v393_v31 = vrot.slane %v896_v30, 7  ;;  %v903_v32 = vld [vmem:[%s1547_s2 + $0x18] sm:$0xff]  ;;  %v568_v44 = vrot.slane %v896_v30, 6  ;;  %v961_v62 = vld [vmem:[%s1547_s2 + $0x40] sm:$0xff] }
   0xc   :  { %v381_v36 = vrot.slane %v903_v32, 7  ;;  %v556_v40 = vrot.slane %v903_v32, 6  ;;  %v934_v49 = vld [vmem:[%s1547_s2 + $0x58] sm:$0xff]  ;;  %v390_v56 = vrot.slane %v939_v50, 7  ;;  %v565_v28 = vrot.slane %v939_v50, 6 }
   0xd   :  { %v410_v34 = vsel %vm394_vm3, %v393_v31, %v882_v23  ;;  %v585_v54 = vsel %vm569_vm4, %v568_v44, %v887_v25  ;;  %v389_v55 = vrot.slane %v934_v49, 7  ;;  %v981_v6 = vld [vmem:[%s1547_s2 + $0x38] sm:$0xff]  ;;  %vm357_vm1 = vcmask 917312  }
   0xe   :  { %v406_v48 = vsel %vm394_vm3, %v381_v36, %v382_v35  ;;  %v581_v51 = vsel %vm569_vm4, %v556_v40, %v557_v39  ;;  %vm361_vm2 = vcmask 982912  }
   0xf   :  { %v398_v63 = vsel %vm394_vm3, %v389_v55, %v390_v56 }
  0x11   :  { %738 = vmatmul.msk.f32.gmra.mxu0 %vm77_vm0, %v58_v8  ;;  %742 = vmatmul.msk.f32.gmra.mxu1 %vm77_vm0, %v62_v9  ;;  %v554_v8 = vrot.slane %v974_v2, 6  ;;  %v561_v9 = vrot.slane %v961_v62, 6 }
  0x13   :  { %750 = vmatmul.msk.f32.gmra.mxu3 %vm77_vm0, %v70_v10  ;;  %746 = vmatmul.msk.f32.gmra.mxu2 %vm77_vm0, %v66_v11  ;;  %v560_v10 = vrot.slane %v981_v6, 6 }
  0x19   :  { %739 = vmatmul.msk.f32.gmra.mxu0 %vm77_vm0, %v59_v12  ;;  %743 = vmatmul.msk.f32.gmra.mxu1 %vm77_vm0, %v63_v13  ;;  %v386_v12 = vrot.slane %v961_v62, 7 }
  0x1b   :  { %747 = vmatmul.msk.f32.gmra.mxu2 %vm77_vm0, %v67_v14  ;;  %751 = vmatmul.msk.f32.gmra.mxu3 %vm77_vm0, %v71_v15  ;;  %v385_v14 = vrot.slane %v981_v6, 7 }
  0x21   :  { %740 = vmatmul.msk.f32.gmra.mxu0 %vm77_vm0, %v60_v16  ;;  %744 = vmatmul.msk.f32.gmra.mxu1 %vm77_vm0, %v64_v17  ;;  %v584_v17 = vsel %vm569_vm4, %v887_v25, %v554_v8 }
  0x23   :  { %748 = vmatmul.msk.f32.gmra.mxu2 %vm77_vm0, %v68_v18  ;;  %752 = vmatmul.msk.f32.gmra.mxu3 %vm77_vm0, %v72_v19  ;;  %v577_v18 = vsel %vm569_vm4, %v560_v10, %v561_v9  ;;  %v402_v19 = vsel %vm394_vm3, %v385_v14, %v386_v12 }
  0x86   :  { %v143_v37 = vpop.f32.mrf.mxu0  ;;  %v155_v38 = vpop.f32.mrf.mxu1 }
  0x87   :  { %v211_v41 = vmul.f32 %v908_v33, %v155_v38  ;;  %v411_v42 = vmul.f32 %v410_v34, %v143_v37  ;;  %v207_v43 = vmul.f32 %v191_v21, %v143_v37  ;;  %v947_v52 = vmul.f32 %v542_v27, %v143_v37 }
  0x88   :  { %v949_v53 = vmul.f32 %v717_v29, %v143_v37  ;;  %v415_v57 = vmul.f32 %v406_v48, %v155_v38  ;;  %v590_v58 = vmul.f32 %v581_v51, %v155_v38  ;;  %v586_v59 = vmul.f32 %v585_v54, %v143_v37  ;;  %v1013_v37 = vld [vmem:[%s1547_s2 + $0x28] sm:$0xff] }
  0x89   :  { %v235_v45 = vsel %vm77_vm0, %v211_v41, 0.0  ;;  %v427_v46 = vsel %vm77_vm0, %v411_v42, 0.0  ;;  %v223_v47 = vsel %vm77_vm0, %v207_v43, 0.0  ;;  %v564_v27 = vrot.slane %v934_v49, 6  ;;  %v1019_v41 = vld [vmem:[%s1547_s2 + $0x48] sm:$0xff] }
  0x8a   :  { %236 = vadd.xlane.f32.xlu2 %v235_v45  ;;  %428 = vadd.xlane.f32.xlu1 %v427_v46  ;;  %v439_v0 = vsel %vm77_vm0, %v415_v57, 0.0  ;;  %v614_v1 = vsel %vm77_vm0, %v590_v58, 0.0  ;;  %v602_v3 = vsel %vm77_vm0, %v586_v59, 0.0  ;;  %v1025_v43 = vld [vmem:[%s1547_s2 + $0x68] sm:$0xff]  ;;  %v387_v48 = vrot.slane %v1019_v41, 7 }
  0x8b   :  { %224 = vadd.xlane.f32.xlu0 %v223_v47  ;;  %v573_v46 = vsel %vm569_vm4, %v564_v27, %v565_v28  ;;  %v379_v54 = vrot.slane %v974_v2, 7 }
  0x8e   :  { %v167_v60 = vpop.f32.mrf.mxu2  ;;  %v179_v61 = vpop.f32.mrf.mxu3 }
  0x8f   :  { %v215_v4 = vmul.f32 %v961_v62, %v167_v60  ;;  %v423_v5 = vmul.f32 %v398_v63, %v179_v61  ;;  %v219_v7 = vmul.f32 %v939_v50, %v179_v61  ;;  %v146_v16 = vpop.f32.mrf.mxu0  ;;  %v594_v24 = vmul.f32 %v577_v18, %v167_v60  ;;  %v158_v29 = vpop.f32.mrf.mxu1  ;;  %v1121_v62 = vld [vmem:[%s1547_s2 + $0x50] sm:$0xff] }
  0x90   :  { %v587_v21 = vmul.f32 %v584_v17, %v146_v16  ;;  %v419_v26 = vmul.f32 %v402_v19, %v167_v60  ;;  %v212_v45 = vmul.f32 %v1013_v37, %v158_v29  ;;  %v598_v51 = vmul.f32 %v573_v46, %v179_v61 }
  0x91   :  { %v247_v11 = vsel %vm77_vm0, %v215_v4, 0.0  ;;  %v463_v13 = vsel %vm77_vm0, %v423_v5, 0.0  ;;  %v259_v15 = vsel %vm77_vm0, %v219_v7, 0.0  ;;  %v626_v38 = vsel %vm77_vm0, %v594_v24, 0.0 }
  0x92   :  { %440 = vadd.xlane.f32.xlu2 %v439_v0  ;;  %615 = vadd.xlane.f32.xlu1 %v614_v1  ;;  %v605_v25 = vsel %vm77_vm0, %v587_v21, 0.0  ;;  %v451_v42 = vsel %vm77_vm0, %v419_v26, 0.0  ;;  %v238_v57 = vsel %vm77_vm0, %v212_v45, 0.0  ;;  %v401_v60 = vsel %vm394_vm3, %v386_v12, %v387_v48 }
  0x93   :  { %603 = vadd.xlane.f32.xlu0 %v602_v3  ;;  %v638_v63 = vsel %vm77_vm0, %v598_v51, 0.0  ;;  %v409_v61 = vsel %vm394_vm3, %v882_v23, %v379_v54  ;;  %v558_v3 = vrot.slane %v1013_v37, 6  ;;  %v566_v4 = vrot.slane %v1025_v43, 6 }
  0x94   :  { %v412_v1 = vmul.f32 %v409_v61, %v146_v16  ;;  %v208_v5 = vmul.f32 %v974_v2, %v146_v16  ;;  %v383_v7 = vrot.slane %v1013_v37, 7  ;;  %v391_v19 = vrot.slane %v1025_v43, 7 }
  0x95   :  { %v572_v23 = vsel %vm569_vm4, %v565_v28, %v566_v4  ;;  %v1086_v28 = vld [vmem:[%s1547_s2 + $0x10] sm:$0xff] }
  0x96   :  { %v182_v34 = vpop.f32.mrf.mxu3  ;;  %v170_v59 = vpop.f32.mrf.mxu2  ;;  %v430_v12 = vsel %vm77_vm0, %v412_v1, 0.0  ;;  %v405_v16 = vsel %vm394_vm3, %v382_v35, %v383_v7  ;;  %v397_v35 = vsel %vm394_vm3, %v390_v56, %v391_v19  ;;  %v555_v46 = vrot.slane %v1086_v28, 6 }
  0x97   :  { %v220_v47 = vmul.f32 %v1025_v43, %v182_v34  ;;  %v420_v0 = vmul.f32 %v401_v60, %v170_v59  ;;  %v599_v17 = vmul.f32 %v572_v23, %v182_v34  ;;  %v416_v21 = vmul.f32 %v405_v16, %v158_v29  ;;  %v149_v24 = vpop.f32.mrf.mxu0  ;;  %v161_v56 = vpop.f32.mrf.mxu1 }
  0x98   :  { %v216_v45 = vmul.f32 %v1019_v41, %v170_v59  ;;  %v388_v23 = vrot.slane %v1121_v62, 7  ;;  %v380_v16 = vrot.slane %v1086_v28, 7  ;;  %v582_v43 = vsel %vm569_vm4, %v555_v46, %v556_v40 }
  0x99   :  { %v262_v58 = vsel %vm77_vm0, %v220_v47, 0.0  ;;  %v641_v26 = vsel %vm77_vm0, %v599_v17, 0.0  ;;  %v442_v33 = vsel %vm77_vm0, %v416_v21, 0.0  ;;  %v562_v47 = vrot.slane %v1019_v41, 6 }
  0x9a   :  { %248 = vadd.xlane.f32.xlu2 %v247_v11  ;;  %464 = vadd.xlane.f32.xlu1 %v463_v13  ;;  %v454_v11 = vsel %vm77_vm0, %v420_v0, 0.0  ;;  %v226_v13 = vsel %vm77_vm0, %v208_v5, 0.0 }
  0x9b   :  { %260 = vadd.xlane.f32.xlu0 %v259_v15  ;;  %v580_v15 = vsel %vm569_vm4, %v557_v39, %v558_v3  ;;  %v1074_v39 = vld [vmem:[%s1547_s2 + $0x30] sm:$0xff]  ;;  %v576_v60 = vsel %vm569_vm4, %v561_v9, %v562_v47 }
  0x9c   :  { %v591_v18 = vmul.f32 %v580_v15, %v158_v29  ;;  %v209_v29 = vmul.f32 %v1086_v28, %v149_v24  ;;  %v595_v0 = vmul.f32 %v576_v60, %v170_v59  ;;  %v563_v15 = vrot.slane %v1121_v62, 6 }
  0x9e   :  { %v229_v50 = vsel %vm77_vm0, %v209_v29, 0.0  ;;  %v173_v5 = vpop.f32.mrf.mxu2  ;;  %v574_v40 = vsel %vm569_vm4, %v563_v15, %v564_v27 }
  0x9f   :  { %v217_v59 = vmul.f32 %v1121_v62, %v173_v5  ;;  %v152_v41 = vpop.f32.mrf.mxu0 }
  0xa2   :  { %627 = vadd.xlane.f32.xlu2 %v626_v38  ;;  %606 = vadd.xlane.f32.xlu1 %v605_v25  ;;  %v617_v25 = vsel %vm77_vm0, %v591_v18, 0.0  ;;  %v384_v38 = vrot.slane %v1074_v39, 7  ;;  %v253_v18 = vsel %vm77_vm0, %v217_v59, 0.0 }
  0xa3   :  { %452 = vadd.xlane.f32.xlu0 %v451_v42  ;;  %v424_v42 = vmul.f32 %v397_v35, %v182_v34  ;;  %v583_v34 = vsel %vm569_vm4, %v554_v8, %v555_v46 }
  0xa4   :  { %v404_v51 = vsel %vm394_vm3, %v383_v7, %v384_v38  ;;  %v588_v61 = vmul.f32 %v583_v34, %v149_v24  ;;  %v185_v7 = vpop.f32.mrf.mxu3 }
  0xa6   :  { %v608_v8 = vsel %vm77_vm0, %v588_v61, 0.0 }
  0xaa   :  { %239 = vadd.xlane.f32.xlu2 %v238_v57  ;;  %263 = vadd.xlane.f32.xlu1 %v262_v58  ;;  %v466_v57 = vsel %vm77_vm0, %v424_v42, 0.0  ;;  %v250_v58 = vsel %vm77_vm0, %v216_v45, 0.0 }
  0xab   :  { %639 = vadd.xlane.f32.xlu0 %v638_v63  ;;  %v417_v63 = vmul.f32 %v404_v51, %v161_v56 }
  0xad   :  { %v445_v1 = vsel %vm77_vm0, %v417_v63, 0.0  ;;  %v164_v63 = vpop.f32.mrf.mxu1 }
  0xb2   :  { %455 = vadd.xlane.f32.xlu1 %v454_v11  ;;  %431 = vadd.xlane.f32.xlu2 %v430_v12  ;;  %v1114_v11 = vld [vmem:[%s1547_s2 + $0x70] sm:$0xff]  ;;  %v629_v12 = vsel %vm77_vm0, %v595_v0, 0.0 }
  0xb3   :  { %227 = vadd.xlane.f32.xlu0 %v226_v13  ;;  %v221_v9 = vmul.f32 %v1114_v11, %v185_v7  ;;  %v213_v13 = vmul.f32 %v1074_v39, %v161_v56  ;;  %v392_v42 = vrot.slane %v1114_v11, 7  ;;  %v567_v34 = vrot.slane %v1114_v11, 6 }
  0xb5   :  { %v265_v17 = vsel %vm77_vm0, %v221_v9, 0.0  ;;  %v241_v21 = vsel %vm77_vm0, %v213_v13, 0.0  ;;  %v396_v2 = vsel %vm394_vm3, %v391_v19, %v392_v42  ;;  %v403_v19 = vsel %vm394_vm3, %v384_v38, %v385_v14  ;;  %v176_v38 = vpop.f32.mrf.mxu2  ;;  %v188_v9 = vpop.f32.mrf.mxu3 }
  0xb6   :  { %v571_v0 = vsel %vm569_vm4, %v566_v4, %v567_v34  ;;  %v218_v4 = vmul.f32 %v934_v49, %v176_v38  ;;  %v222_v46 = vmul.f32 %v896_v30, %v188_v9  ;;  %v597_v13 = vmul.f32 %v574_v40, %v176_v38 }
  0xb7   :  { %v395_v27 = vsel %vm394_vm3, %v392_v42, %v393_v31 }
  0xb8   :  { %v426_v31 = vmul.f32 %v395_v27, %v188_v9 }
  0xba   :  { %642 = vadd.xlane.f32.xlu1 %v641_v26  ;;  %618 = vadd.xlane.f32.xlu2 %v617_v25  ;;  %v400_v26 = vsel %vm394_vm3, %v387_v48, %v388_v23  ;;  %v575_v25 = vsel %vm569_vm4, %v562_v47, %v563_v15  ;;  %v570_v15 = vsel %vm569_vm4, %v567_v34, %v568_v44  ;;  %v472_v42 = vsel %vm77_vm0, %v426_v31, 0.0 }
  0xbb   :  { %443 = vadd.xlane.f32.xlu0 %v442_v33  ;;  %v408_v33 = vsel %vm394_vm3, %v379_v54, %v380_v16  ;;  %v421_v35 = vmul.f32 %v400_v26, %v173_v5  ;;  %v596_v29 = vmul.f32 %v575_v25, %v173_v5  ;;  %v210_v54 = vmul.f32 %v903_v32, %v152_v41 }
  0xbc   :  { %v413_v45 = vmul.f32 %v408_v33, %v149_v24  ;;  %v407_v5 = vsel %vm394_vm3, %v380_v16, %v381_v36  ;;  %v268_v16 = vsel %vm77_vm0, %v222_v46, 0.0  ;;  %v601_v44 = vmul.f32 %v570_v15, %v188_v9 }
  0xbd   :  { %v457_v51 = vsel %vm77_vm0, %v421_v35, 0.0  ;;  %v632_v48 = vsel %vm77_vm0, %v596_v29, 0.0  ;;  %v232_v60 = vsel %vm77_vm0, %v210_v54, 0.0  ;;  %v544_v34 = vsel %vm77_vm0, %v947_v52, 0.0 }
  0xbe   :  { %v433_v47 = vsel %vm77_vm0, %v413_v45, 0.0  ;;  %v647_v29 = vsel %vm77_vm0, %v601_v44, 0.0 }
  0xc2   :  { %467 = vadd.xlane.f32.xlu2 %v466_v57  ;;  %230 = vadd.xlane.f32.xlu1 %v229_v50  ;;  %v559_v50 = vrot.slane %v1074_v39, 6  ;;  %v425_v57 = vmul.f32 %v396_v2, %v185_v7 }
  0xc3   :  { %251 = vadd.xlane.f32.xlu0 %v250_v58 }
  0xc4   :  { %v579_v24 = vsel %vm569_vm4, %v558_v3, %v559_v50  ;;  %v469_v61 = vsel %vm77_vm0, %v425_v57, 0.0  ;;  %v214_v3 = vmul.f32 %v981_v6, %v164_v63  ;;  %v578_v32 = vsel %vm569_vm4, %v559_v50, %v560_v10 }
  0xc5   :  { %v592_v58 = vmul.f32 %v579_v24, %v161_v56  ;;  %v418_v56 = vmul.f32 %v403_v19, %v164_v63  ;;  %v593_v59 = vmul.f32 %v578_v32, %v164_v63  ;;  %v635_v6 = vsel %vm77_vm0, %v597_v13, 0.0 }
  0xc6   :  { %v244_v14 = vsel %vm77_vm0, %v214_v3, 0.0  ;;  %vm551_vm4 = vcmask 57344  }
  0xc7   :  { %v620_v37 = vsel %vm77_vm0, %v592_v58, 0.0  ;;  %v448_v39 = vsel %vm77_vm0, %v418_v56, 0.0  ;;  %v623_v10 = vsel %vm77_vm0, %v593_v59, 0.0  ;;  %v719_v58 = vsel %vm77_vm0, %v949_v53, 0.0 }
  0xca   :  { %609 = vadd.xlane.f32.xlu2 %v608_v8  ;;  %446 = vadd.xlane.f32.xlu1 %v445_v1  ;;  %v600_v1 = vmul.f32 %v571_v0, %v185_v7  ;;  %v414_v7 = vmul.f32 %v407_v5, %v152_v41  ;;  %v589_v8 = vmul.f32 %v582_v43, %v152_v41 }
  0xcb   :  { %630 = vadd.xlane.f32.xlu0 %v629_v12  ;;  %v256_v12 = vsel %vm77_vm0, %v218_v4, 0.0 }
  0xcc   :  { %v644_v11 = vsel %vm77_vm0, %v600_v1, 0.0  ;;  %v436_v36 = vsel %vm77_vm0, %v414_v7, 0.0  ;;  %v611_v28 = vsel %vm77_vm0, %v589_v8, 0.0 }
  0xd2   :  { %266 = vadd.xlane.f32.xlu2 %v265_v17  ;;  %254 = vadd.xlane.f32.xlu1 %v253_v18  ;;  %v1203_v17 = vand.u32 127, %v304_v20  ;;  %v399_v20 = vsel %vm394_vm3, %v388_v23, %v389_v55  ;;  %v1222_v18 = vstv %s1549_s5  ;;  %vm365_vm3 = vcmask 1048512  }
  0xd3   :  { %242 = vadd.xlane.f32.xlu0 %v241_v21  ;;  %v422_v25 = vmul.f32 %v399_v20, %v176_v38 }
  0xd4   :  { %v1225_v30 = vadd.s32 4294967264, %v1203_v17  ;;  %v1265_v63 = vadd.s32 4294967200, %v1203_v17  ;;  %v1296_v9 = vadd.s32 4294967256, %v1203_v17  ;;  %v1299_v32 = vadd.s32 4294967192, %v1203_v17 }
  0xd5   :  { %v460_v45 = vsel %vm77_vm0, %v422_v25, 0.0  ;;  %v1317_v15 = vadd.s32 4294967224, %v1203_v17  ;;  %vm353_vm0 = vcmask 851712  }
  0xda   :  { %458 = vadd.xlane.f32.xlu2 %v457_v51  ;;  %633 = vadd.xlane.f32.xlu1 %v632_v48 }
  0xdb   :  { %434 = vadd.xlane.f32.xlu0 %v433_v47 }
  0xe2   :  { %470 = vadd.xlane.f32.xlu2 %v469_v61  ;;  %233 = vadd.xlane.f32.xlu1 %v232_v60  ;;  %v1262_v60 = vadd.s32 4294967232, %v1203_v17 }
  0xe3   :  { %621 = vadd.xlane.f32.xlu0 %v620_v37 }
  0xea   :  { %449 = vadd.xlane.f32.xlu2 %v448_v39  ;;  %245 = vadd.xlane.f32.xlu1 %v244_v14  ;;  %v307_v39 = vadd.s32 4294967288, %v1203_v17 }
  0xeb   :  { %645 = vadd.xlane.f32.xlu0 %v644_v11 }
  0xf2   :  { %257 = vadd.xlane.f32.xlu2 %v256_v12  ;;  %437 = vadd.xlane.f32.xlu1 %v436_v36 }
  0xf3   :  { %612 = vadd.xlane.f32.xlu0 %v611_v28 }
  0xfa   :  { %636 = vadd.xlane.f32.xlu2 %v635_v6  ;;  %624 = vadd.xlane.f32.xlu1 %v623_v10 }
  0xfb   :  { %269 = vadd.xlane.f32.xlu0 %v268_v16 }
  0xfd   :  { %v237_v21 = vpop.xlane.xlu2 %236  ;;  %v429_v26 = vpop.xlane.xlu1 %428 }
  0xfe   :  { %v1228_v49 = vadd.f32 %v1222_v18, %v237_v21  ;;  %v1231_v22 = vadd.f32 %v429_v26, %v1222_v18  ;;  %v225_v55 = vpop.xlane.xlu0 %224 }
  0xff   :  { %v1234_v62 = vadd.f32 %v1222_v18, %v225_v55 }
 0x100   :  { %v320_v23 = vperm.slane %v1228_v49, %v1225_v30  ;;  %v507_v33 = vperm.slane %v1231_v22, %v1203_v17 }
 0x101   :  { %v306_v35 = vperm.slane %v1234_v62, %v1203_v17  ;;  %v311_v62 = vadd.s32 4294967280, %v1203_v17 }
 0x102   :  { %648 = vadd.xlane.f32.xlu2 %v647_v29  ;;  %473 = vadd.xlane.f32.xlu1 %v472_v42 }
 0x103   :  { %461 = vadd.xlane.f32.xlu0 %v460_v45 }
 0x105   :  { %v441_v50 = vpop.xlane.xlu2 %440  ;;  %v616_v41 = vpop.xlane.xlu1 %615 }
 0x106   :  { %v1246_v51 = vadd.f32 %v441_v50, %v1222_v18  ;;  %v1249_v48 = vadd.f32 %v616_v41, %v1222_v18  ;;  %v604_v47 = vpop.xlane.xlu0 %603 }
 0x107   :  { %v650_v2 = vadd.f32 %v604_v47, %v1222_v18 }
 0x108   :  { %v514_v54 = vperm.slane %v1246_v51, %v1225_v30  ;;  %v689_v24 = vperm.slane %v1249_v48, %v1225_v30 }
 0x109   :  { %v682_v57 = vperm.slane %v650_v2, %v1203_v17 }
 0x10a   :  { %720 = vadd.xlane.f32.xlu1 %v719_v58 }
 0x10b   :  { %545 = vadd.xlane.f32.xlu0 %v544_v34 }
 0x10d   :  { %v249_v19 = vpop.xlane.xlu2 %248  ;;  %v465_v61 = vpop.xlane.xlu1 %464 }
 0x10e   :  { %v1268_v37 = vadd.f32 %v1222_v18, %v249_v19  ;;  %v1271_v3 = vadd.f32 %v465_v61, %v1222_v18  ;;  %v261_v53 = vpop.xlane.xlu0 %260 }
 0x10f   :  { %v1274_v56 = vadd.f32 %v1222_v18, %v261_v53 }
 0x110   :  { %v336_v52 = vperm.slane %v1268_v37, %v1262_v60  ;;  %v530_v0 = vperm.slane %v1271_v3, %v1265_v63 }
 0x111   :  { %v352_v1 = vperm.slane %v1274_v56, %v1265_v63 }
 0x115   :  { %v628_v14 = vpop.xlane.xlu2 %627  ;;  %v607_v38 = vpop.xlane.xlu1 %606 }
 0x116   :  { %v1284_v5 = vadd.f32 %v628_v14, %v1222_v18  ;;  %v453_v11 = vpop.xlane.xlu0 %452  ;;  %v651_v43 = vadd.f32 %v607_v38, %v1222_v18 }
 0x117   :  { %v1288_v4 = vadd.f32 %v453_v11, %v1222_v18 }
 0x118   :  { %v697_v7 = vperm.slane %v1284_v5, %v1262_v60  ;;  %v683_v8 = vperm.slane %v651_v43, %v307_v39 }
 0x119   :  { %v522_v12 = vperm.slane %v1288_v4, %v1262_v60 }
 0x11a   :  { %v684_v36 = vsel %vm309_vm5, %v683_v8, %v682_v57 }
 0x11d   :  { %v240_v40 = vpop.xlane.xlu2 %239  ;;  %v264_v28 = vpop.xlane.xlu1 %263 }
 0x11e   :  { %v1302_v46 = vadd.f32 %v1222_v18, %v240_v40  ;;  %v640_v59 = vpop.xlane.xlu0 %639  ;;  %v1305_v13 = vadd.f32 %v1222_v18, %v264_v28 }
 0x11f   :  { %v1308_v16 = vadd.f32 %v640_v59, %v1222_v18 }
 0x120   :  { %v324_v6 = vperm.slane %v1302_v46, %v1296_v9  ;;  %v356_v10 = vperm.slane %v1305_v13, %v1299_v32 }
 0x121   :  { %v705_v27 = vperm.slane %v1308_v16, %v1265_v63 }
 0x125   :  { %v456_v20 = vpop.xlane.xlu1 %455  ;;  %v432_v31 = vpop.xlane.xlu2 %431 }
 0x126   :  { %v1320_v44 = vadd.f32 %v456_v20, %v1222_v18  ;;  %v476_v21 = vadd.f32 %v432_v31, %v1222_v18  ;;  %v228_v26 = vpop.xlane.xlu0 %227 }
 0x127   :  { %v273_v25 = vadd.f32 %v1222_v18, %v228_v26 }
 0x128   :  { %v524_v55 = vperm.slane %v1320_v44, %v1317_v15  ;;  %v508_v29 = vperm.slane %v476_v21, %v307_v39 }
 0x129   :  { %v308_v42 = vperm.slane %v273_v25, %v307_v39 }
 0x12a   :  { %v509_v45 = vsel %vm309_vm5, %v508_v29, %v507_v33 }
 0x12b   :  { %v310_v50 = vsel %vm309_vm5, %v308_v42, %v306_v35 }
 0x12d   :  { %v643_v41 = vpop.xlane.xlu1 %642  ;;  %v1334_v47 = vpop.xlane.xlu2 %618 }
 0x12e   :  { %v1337_v2 = vadd.f32 %v643_v41, %v1222_v18  ;;  %v444_v57 = vpop.xlane.xlu0 %443 }
 0x12f   :  { %v1340_v58 = vadd.f32 %v444_v57, %v1222_v18  ;;  %v1367_v57 = vadd.s32 4294967272, %v1203_v17 }
 0x130   :  { %v707_v22 = vperm.slane %v1337_v2, %v1299_v32 }
 0x131   :  { %v516_v33 = vperm.slane %v1340_v58, %v1296_v9 }
 0x135   :  { %v468_v34 = vpop.xlane.xlu2 %467  ;;  %v231_v35 = vpop.xlane.xlu1 %230 }
 0x136   :  { %v1348_v19 = vadd.f32 %v468_v34, %v1222_v18  ;;  %v252_v61 = vpop.xlane.xlu0 %251  ;;  %v274_v53 = vadd.f32 %v1222_v18, %v231_v35 }
 0x138   :  { %v532_v39 = vperm.slane %v1348_v19, %v1299_v32  ;;  %v312_v14 = vperm.slane %v274_v53, %v311_v62 }
 0x13a   :  { %v314_v38 = vsel %vm313_vm6, %v312_v14, %v310_v50 }
 0x13d   :  { %v610_v11 = vpop.xlane.xlu2 %609  ;;  %v447_v43 = vpop.xlane.xlu1 %446 }
 0x13e   :  { %v1354_v8 = vpop.xlane.xlu0 %630  ;;  %v652_v40 = vadd.f32 %v610_v11, %v1222_v18 }
 0x140   :  { %v685_v28 = vperm.slane %v652_v40, %v311_v62  ;;  %v1375_v40 = vadd.s32 4294967248, %v1203_v17 }
 0x142   :  { %v1358_v59 = vsel %vm313_vm6, %v685_v28, %v684_v36 }
 0x145   :  { %v267_v20 = vpop.xlane.xlu2 %266  ;;  %v255_v31 = vpop.xlane.xlu1 %254 }
 0x146   :  { %v243_v21 = vpop.xlane.xlu0 %242 }
 0x147   :  { %v278_v14 = vadd.f32 %v1222_v18, %v243_v21  ;;  %v1384_v21 = vadd.s32 4294967240, %v1203_v17 }
 0x14d   :  { %v1360_v26 = vpop.xlane.xlu2 %458  ;;  %v1362_v25 = vpop.xlane.xlu1 %633 }
 0x14e   :  { %v435_v29 = vpop.xlane.xlu0 %434 }
 0x14f   :  { %v477_v42 = vadd.f32 %v435_v29, %v1222_v18 }
 0x151   :  { %v510_v50 = vperm.slane %v477_v42, %v311_v62  ;;  %v328_v62 = vperm.slane %v278_v14, %v1375_v40  ;;  %v282_v14 = vadd.f32 %v1222_v18, %v255_v31 }
 0x153   :  { %v511_v41 = vsel %vm313_vm6, %v510_v50, %v509_v45 }
 0x155   :  { %v1369_v34 = vpop.xlane.xlu2 %470  ;;  %v234_v36 = vpop.xlane.xlu1 %233 }
 0x156   :  { %v622_v35 = vpop.xlane.xlu0 %621  ;;  %v275_v53 = vadd.f32 %v1222_v18, %v234_v36  ;;  %v281_v36 = vadd.f32 %v1222_v18, %v252_v61  ;;  %v655_v61 = vadd.f32 %v1334_v47, %v1222_v18 }
 0x158   :  { %v316_v11 = vperm.slane %v275_v53, %v1367_v57 }
 0x15a   :  { %v318_v45 = vsel %vm317_vm7, %v316_v11, %v314_v38 }
 0x15b   :  { %v322_v28 = vsel %vm321_vm8, %v320_v23, %v318_v45  ;;  %v1396_v23 = vadd.s32 4294967216, %v1203_v17 }
 0x15c   :  { %v326_v29 = vsel %vm325_vm9, %v324_v6, %v322_v28  ;;  %v340_v6 = vperm.slane %v281_v36, %v1317_v15 }
 0x15d   :  { %v450_v42 = vpop.xlane.xlu2 %449  ;;  %v330_v50 = vsel %vm329_vm10, %v328_v62, %v326_v29  ;;  %v246_v38 = vpop.xlane.xlu1 %245  ;;  %v344_v45 = vperm.slane %v282_v14, %v1396_v23  ;;  %v1410_v62 = vadd.s32 4294967208, %v1203_v17  ;;  %v481_v29 = vadd.f32 %v447_v43, %v1222_v18 }
 0x15e   :  { %v1392_v53 = vpop.xlane.xlu0 %645  ;;  %v279_v49 = vadd.f32 %v1222_v18, %v246_v38  ;;  %v286_v38 = vadd.f32 %v1222_v18, %v267_v20 }
 0x160   :  { %v332_v46 = vperm.slane %v279_v49, %v1384_v21 }
 0x162   :  { %v334_v11 = vsel %vm333_vm11, %v332_v46, %v330_v50  ;;  %v1415_v50 = vadd.s32 4294967184, %v1203_v17  ;;  %v691_v46 = vperm.slane %v655_v61, %v1296_v9 }
 0x163   :  { %v338_v31 = vsel %vm337_vm12, %v336_v52, %v334_v11  ;;  %v482_v11 = vadd.f32 %v450_v42, %v1222_v18 }
 0x164   :  { %v342_v28 = vsel %vm341_vm13, %v340_v6, %v338_v31  ;;  %v656_v6 = vadd.f32 %v622_v35, %v1222_v18  ;;  %v518_v31 = vperm.slane %v481_v29, %v1375_v40  ;;  %v485_v35 = vadd.f32 %v1360_v26, %v1222_v18 }
 0x165   :  { %v258_v47 = vpop.xlane.xlu2 %257  ;;  %v346_v36 = vsel %vm345_vm14, %v344_v45, %v342_v28  ;;  %v438_v49 = vpop.xlane.xlu1 %437  ;;  %v360_v28 = vperm.slane %v286_v38, %v1415_v50 }
 0x166   :  { %v283_v37 = vadd.f32 %v1222_v18, %v258_v47  ;;  %v613_v14 = vpop.xlane.xlu0 %612  ;;  %v478_v52 = vadd.f32 %v438_v49, %v1222_v18  ;;  %v693_v42 = vperm.slane %v656_v6, %v1375_v40 }
 0x167   :  { %v653_v43 = vadd.f32 %v613_v14, %v1222_v18 }
 0x168   :  { %v348_v20 = vperm.slane %v283_v37, %v1410_v62  ;;  %v512_v45 = vperm.slane %v478_v52, %v1367_v57 }
 0x169   :  { %v687_v47 = vperm.slane %v653_v43, %v1367_v57  ;;  %v520_v57 = vperm.slane %v482_v11, %v1384_v21 }
 0x16a   :  { %v350_v61 = vsel %vm349_vm15, %v348_v20, %v346_v36  ;;  %v513_v49 = vsel %vm317_vm7, %v512_v45, %v511_v41  ;;  %v660_v36 = vadd.f32 %v1362_v25, %v1222_v18 }
 0x16b   :  { %v354_v29 = vsel %vm353_vm0, %v352_v1, %v350_v61  ;;  %v688_v38 = vsel %vm317_vm7, %v687_v47, %v1358_v59  ;;  %v515_v26 = vsel %vm321_vm8, %v514_v54, %v513_v49  ;;  %v363_v59 = vadd.s32 4294967176, %v1203_v17 }
 0x16c   :  { %v690_v41 = vsel %vm321_vm8, %v689_v24, %v688_v38  ;;  %v517_v56 = vsel %vm325_vm9, %v516_v33, %v515_v26  ;;  %v358_v1 = vsel %vm357_vm1, %v356_v10, %v354_v29  ;;  %v659_v24 = vadd.f32 %v1354_v8, %v1222_v18 }
 0x16d   :  { %v519_v51 = vsel %vm329_vm10, %v518_v31, %v517_v56  ;;  %v637_v54 = vpop.xlane.xlu2 %636  ;;  %v362_v40 = vsel %vm361_vm2, %v360_v28, %v358_v1  ;;  %v692_v30 = vsel %vm325_vm9, %v691_v46, %v690_v41  ;;  %v625_v48 = vpop.xlane.xlu1 %624  ;;  %v526_v33 = vperm.slane %v485_v35, %v1396_v23 }
 0x16e   :  { %v270_v9 = vpop.xlane.xlu0 %269  ;;  %v694_v58 = vsel %vm329_vm10, %v693_v42, %v692_v30  ;;  %v657_v13 = vadd.f32 %v625_v48, %v1222_v18  ;;  %v521_v10 = vsel %vm333_vm11, %v520_v57, %v519_v51  ;;  %v661_v8 = vadd.f32 %v637_v54, %v1222_v18 }
 0x16f   :  { %v287_v37 = vadd.f32 %v1222_v18, %v270_v9  ;;  %v523_v14 = vsel %vm337_vm12, %v522_v12, %v521_v10  ;;  %v699_v43 = vperm.slane %v659_v24, %v1317_v15  ;;  %v701_v4 = vperm.slane %v660_v36, %v1396_v23 }
 0x170   :  { %v695_v52 = vperm.slane %v657_v13, %v1384_v21  ;;  %v525_v46 = vsel %vm341_vm13, %v524_v55, %v523_v14  ;;  %v664_v12 = vadd.f32 %v1392_v53, %v1222_v18  ;;  %v703_v55 = vperm.slane %v661_v8, %v1410_v62 }
 0x171   :  { %v364_v6 = vperm.slane %v287_v37, %v363_v59  ;;  %v527_v25 = vsel %vm345_vm14, %v526_v33, %v525_v46  ;;  %v489_v47 = vadd.f32 %v1369_v34, %v1222_v18 }
 0x172   :  { %v696_v11 = vsel %vm333_vm11, %v695_v52, %v694_v58  ;;  %v709_v60 = vperm.slane %v664_v12, %v1415_v50 }
 0x173   :  { %v366_v20 = vsel %vm365_vm3, %v364_v6, %v362_v40  ;;  %v698_v44 = vsel %vm337_vm12, %v697_v7, %v696_v11  ;;  %v534_v34 = vperm.slane %v489_v47, %v1415_v50 }
 0x174   :  { %368 = vst [vmem:[%s1550_s6] sm:$0x1] %v366_v20  ;;  %v700_v15 = vsel %vm341_vm13, %v699_v43, %v698_v44 }
 0x175   :  { %v702_v21 = vsel %vm345_vm14, %v701_v4, %v700_v15  ;;  %v649_v23 = vpop.xlane.xlu2 %648  ;;  %v474_v45 = vpop.xlane.xlu1 %473 }
 0x176   :  { %v665_v53 = vadd.f32 %v649_v23, %v1222_v18  ;;  %v704_v31 = vsel %vm349_vm15, %v703_v55, %v702_v21  ;;  %v462_v28 = vpop.xlane.xlu0 %461  ;;  %v490_v29 = vadd.f32 %v474_v45, %v1222_v18 }
 0x177   :  { %v706_v5 = vsel %vm353_vm0, %v705_v27, %v704_v31  ;;  %v486_v7 = vadd.f32 %v462_v28, %v1222_v18 }
 0x178   :  { %v708_v35 = vsel %vm357_vm1, %v707_v22, %v706_v5  ;;  %v711_v61 = vperm.slane %v665_v53, %v363_v59 }
 0x179   :  { %v710_v49 = vsel %vm361_vm2, %v709_v60, %v708_v35  ;;  %v528_v42 = vperm.slane %v486_v7, %v1410_v62  ;;  %v536_v62 = vperm.slane %v490_v29, %v363_v59 }
 0x17a   :  { %v712_v16 = vsel %vm365_vm3, %v711_v61, %v710_v49 }
 0x17b   :  { %714 = vst [vmem:[%s1550_s6 + $0x2] sm:$0x1] %v712_v16  ;;  %v529_v27 = vsel %vm349_vm15, %v528_v42, %v527_v25 }
 0x17c   :  { %v531_v2 = vsel %vm353_vm0, %v530_v0, %v529_v27 }
 0x17d   :  { %v533_v22 = vsel %vm357_vm1, %v532_v39, %v531_v2  ;;  %v721_v38 = vpop.xlane.xlu1 %720 }
 0x17e   :  { %v535_v26 = vsel %vm361_vm2, %v534_v34, %v533_v22  ;;  %v546_v57 = vpop.xlane.xlu0 %545  ;;  %v722_v41 = vadd.f32 %v721_v38, %v1222_v18 }
 0x17f   :  { %v537_v56 = vsel %vm365_vm3, %v536_v62, %v535_v26  ;;  %v547_v50 = vadd.f32 %v546_v57, %v1222_v18 }
 0x180   :  { %539 = vst [vmem:[%s1550_s6 + $0x1] sm:$0x1] %v537_v56  ;;  %v724_v63 = vperm.slane %v722_v41, %v1203_v17 }
 0x181   :  { %v549_v3 = vperm.slane %v547_v50, %v1203_v17 }
 0x182   :  { %726 = vst.msk [vmem:[%s1550_s6 + $0x2] sm:$0x1] %vm551_vm4, %v724_v63 }
 0x183   :  { %552 = vst.msk [vmem:[%s1550_s6 + $0x1] sm:$0x1] %vm551_vm4, %v549_v3 }

</bundles_post_ra>
